<compile_context>
chip_gen: v7x
topology: tpu7x:2x2x1
jax: 0.10.0
libtpu: 0.0.40
codegen_flags: <defaults>
</compile_context>

<pallas_src>
import functools

import jax
import jax.numpy as jnp
from jax.experimental import pallas as pl
from jax.experimental.pallas import tpu as pltpu


def _mlp_kernel(xT_ref, tT_ref, w1_ref, b1_ref, w2_ref, b2_ref,
                w3_ref, b3_ref, oT_ref):
    dx = xT_ref.shape[0]
    dt = tT_ref.shape[0]

    # ---- fc1 on hstack(x, t), fused: unrolled rank-1 broadcast updates -----
    # dx/dt are tiny static ints, so this unrolls into a few VPU FMAs and
    # avoids both a concat relayout and a K=1 MXU matmul.
    h = b1_ref[...].astype(jnp.float32)                        # [hid, 1]
    for j in range(dx):
        h = h + w1_ref[:, j:j + 1] * xT_ref[j:j + 1, :]        # -> [hid, tile]
    for j in range(dt):
        h = h + w1_ref[:, dx + j:dx + j + 1] * tT_ref[j:j + 1, :]
    h = jnp.tanh(h)

    # ---- fc2 + tanh (MXU) ---------------------------------------------------
    h = jnp.dot(w2_ref[...], h, preferred_element_type=jnp.float32)
    h = jnp.tanh(h + b2_ref[...])

    # ---- fc4 output head (MXU) ----------------------------------------------
    o = jnp.dot(w3_ref[...], h, preferred_element_type=jnp.float32)
    o = o + b3_ref[...]
    oT_ref[...] = o.astype(oT_ref.dtype)


@functools.partial(jax.jit, static_argnames=("tile_n",))
def nn_forward(x, t, params, *, tile_n=4096):
    """Pallas equivalent of NN.forward(x, t).

    x: [N, dx], t: [N, dt].  params holds PyTorch-layout weights:
      w1 [hid, dx+dt], b1 [hid], w2 [hid, hid], b2 [hid],
      w3 [out, hid],  b3 [out].
    """
    n, dx = x.shape
    dt = t.shape[1]
    hid = params["w1"].shape[0]
    out_dim = params["w3"].shape[0]

    # Transposed ("batch on lanes") operands.  For column inputs/outputs
    # (dx = dt = out = 1, the PINN case) these are pure reshapes in HBM.
    xT = x.T                                    # [dx, n]
    tT = t.T                                    # [dt, n]
    b1 = params["b1"].reshape(hid, 1)
    b2 = params["b2"].reshape(hid, 1)
    b3 = params["b3"].reshape(out_dim, 1)

    # Lane-aligned batch tile; per-tile footprint (streamed slabs + [hid,tile]
    # activations) is well under scoped VMEM on v5e/v6e/v7x.
    if n <= tile_n:
        tn = n
    else:
        tn = max(128, (tile_n // 128) * 128)
    grid = (pl.cdiv(n, tn),)

    stream = lambda rows: pl.BlockSpec((rows, tn), lambda i: (0, i))
    resident = lambda shape: pl.BlockSpec(shape, lambda i: (0, 0))

    out_T = pl.pallas_call(
        _mlp_kernel,
        out_shape=jax.ShapeDtypeStruct((out_dim, n), x.dtype),
        grid=grid,
        in_specs=[
            stream(dx),                          # xT  (pipelined per tile)
            stream(dt),                          # tT  (pipelined per tile)
            resident(params["w1"].shape),        # w1  (VMEM-resident)
            resident((hid, 1)),                  # b1
            resident(params["w2"].shape),        # w2
            resident((hid, 1)),                  # b2
            resident(params["w3"].shape),        # w3
            resident((out_dim, 1)),              # b3
        ],
        out_specs=pl.BlockSpec((out_dim, tn), lambda i: (0, i)),
        compiler_params=pltpu.CompilerParams(
            dimension_semantics=("parallel",),   # shard tiles across TCs on v7x
        ),
    )(xT, tT, params["w1"], b1, params["w2"], b2, params["w3"], b3)

    return out_T.T                               # [n, out_dim]


def init_params(key, input_dim, hid_dim, output_dim, dtype=jnp.float32):
    """nn.Linear-style init: uniform(-1/sqrt(fan_in), +1/sqrt(fan_in)),
    weights stored in PyTorch [out_features, in_features] layout."""
    ks = jax.random.split(key, 6)

    def lin(kw, kb, fan_in, fan_out):
        bound = 1.0 / float(fan_in) ** 0.5
        w = jax.random.uniform(kw, (fan_out, fan_in), dtype, -bound, bound)
        b = jax.random.uniform(kb, (fan_out,), dtype, -bound, bound)
        return w, b

    w1, b1 = lin(ks[0], ks[1], input_dim, hid_dim)
    w2, b2 = lin(ks[2], ks[3], hid_dim, hid_dim)
    w3, b3 = lin(ks[4], ks[5], hid_dim, output_dim)
    return {"w1": w1, "b1": b1, "w2": w2, "b2": b2, "w3": w3, "b3": b3}


def nn_reference(x, t, p):
    """Pure-JAX reference for correctness check."""
    h = jnp.concatenate([x, t], axis=-1)
    h = jnp.tanh(h @ p["w1"].T + p["b1"])
    h = jnp.tanh(h @ p["w2"].T + p["b2"])
    return h @ p["w3"].T + p["b3"]


if __name__ == "__main__":
    # x, t are [batch, 1] columns (typical PINN usage) -> input_dim = 2.
    batch, hid_dim, output_dim = 8, 32, 1

    key = jax.random.PRNGKey(0)
    kx, kt, kp = jax.random.split(key, 3)
    x = jax.random.normal(kx, (batch, 1), jnp.float32)
    t = jax.random.normal(kt, (batch, 1), jnp.float32)
    params = init_params(kp, input_dim=2, hid_dim=hid_dim, output_dim=output_dim)

    out = jax.block_until_ready(nn_forward(x, t, params, tile_n=4096))
    ref = nn_reference(x, t, params)
    assert out.shape == (batch, output_dim)
    assert jnp.allclose(out, ref, atol=1e-5, rtol=1e-5), \
        float(jnp.max(jnp.abs(out - ref)))

    # Exercise the batch-tiled grid path (multi-step grid, partial last tile).
    n_big = 1000
    kx2, kt2 = jax.random.split(kx)
    x2 = jax.random.normal(kx2, (n_big, 1), jnp.float32)
    t2 = jax.random.normal(kt2, (n_big, 1), jnp.float32)
    out2 = jax.block_until_ready(nn_forward(x2, t2, params, tile_n=256))
    ref2 = nn_reference(x2, t2, params)
    assert out2.shape == (n_big, output_dim)
    assert jnp.allclose(out2, ref2, atol=1e-5, rtol=1e-5), \
        float(jnp.max(jnp.abs(out2 - ref2)))

    print("KERNEL_OK")
</pallas_src>

<mosaic_0001>
module attributes {stable_mosaic.version = 11 : i64} {
  func.func @_mlp_kernel(%arg0: i32, %arg1: memref<1x8xf32, #tpu.memory_space<vmem>>, %arg2: memref<1x8xf32, #tpu.memory_space<vmem>>, %arg3: memref<32x2xf32, #tpu.memory_space<vmem>>, %arg4: memref<32x1xf32, #tpu.memory_space<vmem>>, %arg5: memref<32x32xf32, #tpu.memory_space<vmem>>, %arg6: memref<32x1xf32, #tpu.memory_space<vmem>>, %arg7: memref<1x32xf32, #tpu.memory_space<vmem>>, %arg8: memref<1x1xf32, #tpu.memory_space<vmem>>, %arg9: memref<1x8xf32, #tpu.memory_space<vmem>>) attributes {dimension_semantics = [#tpu.dimension_semantics<parallel>], iteration_bounds = array<i64: 1>, scalar_prefetch = 0 : i64, scratch_operands = 0 : i64, tpu.core_type = #tpu.core_type<tc>, window_params = [{transform_indices = @transform_0, window_bounds = array<i64: 1, 8>}, {transform_indices = @transform_1, window_bounds = array<i64: 1, 8>}, {pipeline_mode = #tpu.pipeline_mode<synchronous>, transform_indices = @transform_2, window_bounds = array<i64: 32, 2>}, {pipeline_mode = #tpu.pipeline_mode<synchronous>, transform_indices = @transform_3, window_bounds = array<i64: 32, 1>}, {pipeline_mode = #tpu.pipeline_mode<synchronous>, transform_indices = @transform_4, window_bounds = array<i64: 32, 32>}, {pipeline_mode = #tpu.pipeline_mode<synchronous>, transform_indices = @transform_5, window_bounds = array<i64: 32, 1>}, {pipeline_mode = #tpu.pipeline_mode<synchronous>, transform_indices = @transform_6, window_bounds = array<i64: 1, 32>}, {pipeline_mode = #tpu.pipeline_mode<synchronous>, transform_indices = @transform_7, window_bounds = array<i64: 1, 1>}, {transform_indices = @transform_8, window_bounds = array<i64: 1, 8>}]} {
    %c0 = arith.constant 0 : index
    %c0_0 = arith.constant 0 : index
    %0 = vector.load %arg4[%c0, %c0_0] : memref<32x1xf32, #tpu.memory_space<vmem>>, vector<32x1xf32>
    %c0_1 = arith.constant 0 : index
    %c0_2 = arith.constant 0 : index
    %1 = vector.load %arg3[%c0_1, %c0_2] : memref<32x2xf32, #tpu.memory_space<vmem>>, vector<32x1xf32>
    %c0_3 = arith.constant 0 : index
    %c0_4 = arith.constant 0 : index
    %2 = vector.load %arg1[%c0_3, %c0_4] : memref<1x8xf32, #tpu.memory_space<vmem>>, vector<1x8xf32>
    %3 = vector.broadcast %1 : vector<32x1xf32> to vector<32x8xf32>
    %4 = vector.broadcast %2 : vector<1x8xf32> to vector<32x8xf32>
    %5 = arith.mulf %3, %4 : vector<32x8xf32>
    %6 = vector.broadcast %0 : vector<32x1xf32> to vector<32x8xf32>
    %7 = arith.addf %6, %5 : vector<32x8xf32>
    %c0_5 = arith.constant 0 : index
    %c1 = arith.constant 1 : index
    %8 = vector.load %arg3[%c0_5, %c1] : memref<32x2xf32, #tpu.memory_space<vmem>>, vector<32x1xf32>
    %c0_6 = arith.constant 0 : index
    %c0_7 = arith.constant 0 : index
    %9 = vector.load %arg2[%c0_6, %c0_7] : memref<1x8xf32, #tpu.memory_space<vmem>>, vector<1x8xf32>
    %10 = vector.broadcast %8 : vector<32x1xf32> to vector<32x8xf32>
    %11 = vector.broadcast %9 : vector<1x8xf32> to vector<32x8xf32>
    %12 = arith.mulf %10, %11 : vector<32x8xf32>
    %13 = arith.addf %7, %12 : vector<32x8xf32>
    %14 = math.tanh %13 : vector<32x8xf32>
    %c0_8 = arith.constant 0 : index
    %c0_9 = arith.constant 0 : index
    %15 = vector.load %arg5[%c0_8, %c0_9] : memref<32x32xf32, #tpu.memory_space<vmem>>, vector<32x32xf32>
    %cst = arith.constant dense<0.000000e+00> : vector<32x8xf32>
    %16 = tpu.matmul %15, %14, %cst {dimension_numbers = #tpu.dot_dimension_numbers<[1], [0], [0], [1], [0, 0, 1, 1], [], []>} : vector<32x32xf32>, vector<32x8xf32>, vector<32x8xf32> -> vector<32x8xf32>
    %c0_10 = arith.constant 0 : index
    %c0_11 = arith.constant 0 : index
    %17 = vector.load %arg6[%c0_10, %c0_11] : memref<32x1xf32, #tpu.memory_space<vmem>>, vector<32x1xf32>
    %18 = vector.broadcast %17 : vector<32x1xf32> to vector<32x8xf32>
    %19 = arith.addf %16, %18 : vector<32x8xf32>
    %20 = math.tanh %19 : vector<32x8xf32>
    %c0_12 = arith.constant 0 : index
    %c0_13 = arith.constant 0 : index
    %21 = vector.load %arg7[%c0_12, %c0_13] : memref<1x32xf32, #tpu.memory_space<vmem>>, vector<1x32xf32>
    %cst_14 = arith.constant dense<0.000000e+00> : vector<1x8xf32>
    %22 = tpu.matmul %21, %20, %cst_14 {dimension_numbers = #tpu.dot_dimension_numbers<[1], [0], [0], [1], [0, 0, 1, 1], [], []>} : vector<1x32xf32>, vector<32x8xf32>, vector<1x8xf32> -> vector<1x8xf32>
    %c0_15 = arith.constant 0 : index
    %c0_16 = arith.constant 0 : index
    %23 = vector.load %arg8[%c0_15, %c0_16] : memref<1x1xf32, #tpu.memory_space<vmem>>, vector<1x1xf32>
    %24 = vector.broadcast %23 : vector<1x1xf32> to vector<1x8xf32>
    %25 = arith.addf %22, %24 : vector<1x8xf32>
    %c0_17 = arith.constant 0 : index
    %c0_18 = arith.constant 0 : index
    %26 = vector.load %arg9[%c0_17, %c0_18] : memref<1x8xf32, #tpu.memory_space<vmem>>, vector<1x8xf32>
    tpu.vector_store %arg9[%c0_17, %c0_18], %25 {strides = array<i32>} : memref<1x8xf32, #tpu.memory_space<vmem>>, vector<1x8xf32>,
    return
  }
  func.func @transform_0(%arg0: i32) -> (i32, i32) {
    %c0_i32 = arith.constant 0 : i32
    %c0_i32_0 = arith.constant 0 : i32
    return %c0_i32, %arg0 : i32, i32
  }
  func.func @transform_1(%arg0: i32) -> (i32, i32) {
    %c0_i32 = arith.constant 0 : i32
    %c0_i32_0 = arith.constant 0 : i32
    return %c0_i32, %arg0 : i32, i32
  }
  func.func @transform_2(%arg0: i32) -> (i32, i32) {
    %c0_i32 = arith.constant 0 : i32
    %c0_i32_0 = arith.constant 0 : i32
    %c0_i32_1 = arith.constant 0 : i32
    return %c0_i32, %c0_i32_0 : i32, i32
  }
  func.func @transform_3(%arg0: i32) -> (i32, i32) {
    %c0_i32 = arith.constant 0 : i32
    %c0_i32_0 = arith.constant 0 : i32
    %c0_i32_1 = arith.constant 0 : i32
    return %c0_i32, %c0_i32_0 : i32, i32
  }
  func.func @transform_4(%arg0: i32) -> (i32, i32) {
    %c0_i32 = arith.constant 0 : i32
    %c0_i32_0 = arith.constant 0 : i32
    %c0_i32_1 = arith.constant 0 : i32
    return %c0_i32, %c0_i32_0 : i32, i32
  }
  func.func @transform_5(%arg0: i32) -> (i32, i32) {
    %c0_i32 = arith.constant 0 : i32
    %c0_i32_0 = arith.constant 0 : i32
    %c0_i32_1 = arith.constant 0 : i32
    return %c0_i32, %c0_i32_0 : i32, i32
  }
  func.func @transform_6(%arg0: i32) -> (i32, i32) {
    %c0_i32 = arith.constant 0 : i32
    %c0_i32_0 = arith.constant 0 : i32
    %c0_i32_1 = arith.constant 0 : i32
    return %c0_i32, %c0_i32_0 : i32, i32
  }
  func.func @transform_7(%arg0: i32) -> (i32, i32) {
    %c0_i32 = arith.constant 0 : i32
    %c0_i32_0 = arith.constant 0 : i32
    %c0_i32_1 = arith.constant 0 : i32
    return %c0_i32, %c0_i32_0 : i32, i32
  }
  func.func @transform_8(%arg0: i32) -> (i32, i32) {
    %c0_i32 = arith.constant 0 : i32
    %c0_i32_0 = arith.constant 0 : i32
    return %c0_i32, %arg0 : i32, i32
  }
}

</mosaic_0001>

<bundles_post_ra>
// kernel: nn_forward.1
= control target key start
LH: loop header
LB: loop body
LE: loop exit
PB: predicated region body
PF: predicated region fallthrough
CT: control target
= control target key end

     0   :  { %s601_s0 = inlined_call_operand.vmem [shape: f32[1,8], index: 0, kind: input, shape index: {}]   ;;  %s602_s1 = inlined_call_operand.vmem [shape: f32[1,8], index: 1, kind: input, shape index: {}]   ;;  %s603_s2 = inlined_call_operand.vmem [shape: f32[32,2], index: 2, kind: input, shape index: {}]   ;;  %s604_s3 = inlined_call_operand.vmem [shape: f32[32,1], index: 3, kind: input, shape index: {}]   ;;  %s605_s4 = inlined_call_operand.vmem [shape: f32[32,32], index: 4, kind: input, shape index: {}]   ;;  %s606_s5 = inlined_call_operand.vmem [shape: f32[32,1], index: 5, kind: input, shape index: {}]   ;;  %s607_s6 = inlined_call_operand.vmem [shape: f32[1,32], index: 6, kind: input, shape index: {}]   ;;  %s608_s7 = inlined_call_operand.<no memory space> [shape: f32[1,1], index: 7, kind: input, shape index: {}]   ;;  %s609_s8 = inlined_call_operand.hbm [shape: f32[1,8], index: 8, kind: output, shape index: {}]  }
   0x1   :  { %v13_v0 = vstv %s608_s7 }
   0x2   :  { %14 = vst [vmem:[#allocation2] sm:$0x1] %v13_v0 }
   0x3   :  { %v36_v1 = vld [vmem:[%s603_s2] sm:$0xff]  ;;  %v473_v3 = vmov 0   ;;  %v37_v4 = vld [vmem:[%s603_s2 + $0x8] sm:$0xff] }
   0x4   :  { %v32_v2 = vld [vmem:[%s604_s3] sm:$0xff]  ;;  %426 = vset.pattern.permute.xlu1 %v473_v3  ;;  %425 = vset.pattern.permute.xlu0 %v473_v3  ;;  %v33_v5 = vld [vmem:[%s604_s3 + $0x8] sm:$0xff] }
   0x5   :  { %43 = vperm.xlu0 %425, %v36_v1   ;;  %73 = vperm.xlu1 %426, %v32_v2  }
   0x6   :  { %15 = vsyncpa [#allocation4], 0  ;;  %v39_v6 = vld [vmem:[%s603_s2 + $0x18] sm:$0xff]  ;;  %v474_v7 = vmov 1   ;;  %v38_v8 = vld [vmem:[%s603_s2 + $0x10] sm:$0xff]  ;;  %vm158_vm0 = vcmask 261120  }
   0x7   :  { %v34_v9 = vld [vmem:[%s604_s3 + $0x10] sm:$0xff]  ;;  %v35_v10 = vld [vmem:[%s604_s3 + $0x18] sm:$0xff]  ;;  %v130_v11 = vld [vmem:[%s605_s4] sm:$0xff]  ;;  %v475_v56 = vmov 0.0|0.0   ;;  %vm476_vm1 = vmmov 0   ;;  %v477_v57 = vmov 0.0  }
   0x8   :  { %388 = vmatprep.mubr.msk.f32.mxu0 %vm158_vm0, %v130_v11  ;;  %v134_v12 = vld [vmem:[%s606_s5] sm:$0xff]  ;;  %v135_v13 = vld [vmem:[%s606_s5 + $0x8] sm:$0xff]  ;;  %v136_v14 = vld [vmem:[%s606_s5 + $0x10] sm:$0xff]  ;;  %413 = vmatprep.subr.bf16.mxu1 %v475_v56  ;;  %s478_s15 = smov [#allocation3]   ;;  %vm344_vm2 = vcmask 57344  }
   0x9   :  { %48 = vperm.xlu0 %425, %v37_v4   ;;  %78 = vperm.xlu1 %426, %v33_v5   ;;  %v261_v15 = vld [vmem:[#allocation2] sm:$0x1]  ;;  %v137_v16 = vld [vmem:[%s606_s5 + $0x18] sm:$0xff]  ;;  %v131_v53 = vld [vmem:[%s605_s4 + $0x8] sm:$0xff]  ;;  %s352_s16 = sshll.u32 %s478_s15, 4  ;;  %s353_s16 = int_to_ptr.vmem [resolvable:$true] %s352_s16 }
   0xa   :  { %v360_v21 = vld [vmem:[%s601_s0] ss:$0 sm:$0xff]  ;;  %v132_v54 = vld [vmem:[%s605_s4 + $0x10] sm:$0xff]  ;;  %v133_v55 = vld [vmem:[%s605_s4 + $0x18] sm:$0xff]  ;;  %402 = vmatprep.mubr.msk.f32.mxu1 %vm476_vm1, %v477_v57  ;;  %s449_s17 = scalar_lea.vmem %s353_s16, 16  ;;  %s453_s18 = scalar_lea.vmem %s353_s16, 32 }
   0xb   :  { %v361_v23 = vld [vmem:[%s602_s1] ss:$0 sm:$0xff]  ;;  %p450_p0 = scmp.ne.s32.totalorder %s353_s16, %s449_s17  ;;  %p454_p1 = scmp.lt.s32.totalorder %s353_s16, %s353_s16 }
   0xc   :  { %p455_p2 = scmp.lt.s32.totalorder %s453_s18, %s449_s17 }
   0xd   :  { %58 = vperm.xlu0 %425, %v39_v6   ;;  %427 = vset.pattern.permute.xlu1 %v474_v7 }
   0xe   :  { %101 = vperm.xlu1 %427, %v37_v4   ;;  %p456_p3 = por %p455_p2, %p454_p1 }
  0x10   :  { %p457_p4 = pnand %p456_p3, %p450_p0 }
  0x11   :  { %429 = vset.pattern.permute.xlu0 %v474_v7 }
  0x12   :  { %97 = vperm.xlu0 %429, %v36_v1   ;;  %428 = vset.pattern.permute.xlu1 %v473_v3 }
  0x13   :  { %53 = vperm.xlu1 %428, %v38_v8  }
  0x16   :  { %105 = vperm.xlu0 %429, %v38_v8  }
  0x17   :  { %83 = vperm.xlu1 %428, %v34_v9  }
  0x1a   :  { %432 = vset.pattern.permute.xlu0 %v473_v3 }
  0x1b   :  { %88 = vperm.xlu1 %428, %v35_v10   ;;  %145 = vperm.xlu0 %432, %v135_v13   ;;  %v267_v13 = vlaneseq }
  0x1f   :  { %430 = vset.pattern.permute.xlu1 %v474_v7  ;;  %264 = vperm.xlu0 %432, %v261_v15  }
  0x20   :  { %109 = vperm.xlu1 %430, %v39_v6  }
  0x24   :  { %431 = vset.pattern.permute.xlu1 %v473_v3 }
  0x25   :  { %140 = vperm.xlu1 %431, %v134_v12   ;;  %v260_v12 = vld [vmem:[%s607_s6] sm:$0x1] }
  0x29   :  { %150 = vperm.xlu1 %431, %v136_v14   ;;  %v268_v14 = vshrl.u32 %v267_v13, 7 }
  0x2b   :  { %v269_v15 = vsub.s32 0, %v268_v14 }
  0x2d   :  { %155 = vperm.xlu1 %431, %v137_v16  }
  0x84   :  { %v44_v17 = vpop.permute.xlu0 %43  ;;  %v74_v18 = vpop.permute.xlu1 %73 }
  0x85   :  { %v67_v26 = vmul.f32 %v360_v21, %v44_v17 }
  0x87   :  { %v91_v31 = vadd.f32 %v74_v18, %v67_v26 }
  0x88   :  { %v49_v19 = vpop.permute.xlu0 %48  ;;  %v79_v20 = vpop.permute.xlu1 %78 }
  0x89   :  { %v68_v22 = vmul.f32 %v360_v21, %v49_v19 }
  0x8b   :  { %v92_v28 = vadd.f32 %v79_v20, %v68_v22 }
  0x8c   :  { %v59_v24 = vpop.permute.xlu0 %58 }
  0x8d   :  { %v102_v25 = vpop.permute.xlu1 %101  ;;  %v70_v41 = vmul.f32 %v360_v21, %v59_v24 }
  0x8e   :  { %v119_v27 = vmul.f32 %v361_v23, %v102_v25 }
  0x90   :  { %v123_v29 = vadd.f32 %v119_v27, %v92_v28 }
  0x91   :  { %v98_v30 = vpop.permute.xlu0 %97 }
  0x92   :  { %v118_v32 = vmul.f32 %v361_v23, %v98_v30  ;;  %v54_v33 = vpop.permute.xlu1 %53  ;;  %433 = vtanh.f32 %v123_v29 }
  0x93   :  { %v69_v37 = vmul.f32 %v360_v21, %v54_v33 }
  0x94   :  { %v122_v34 = vadd.f32 %v118_v32, %v91_v31 }
  0x95   :  { %v106_v36 = vpop.permute.xlu0 %105 }
  0x96   :  { %435 = vtanh.f32 %v122_v34  ;;  %v84_v35 = vpop.permute.xlu1 %83  ;;  %v120_v39 = vmul.f32 %v361_v23, %v106_v36 }
  0x97   :  { %v93_v40 = vadd.f32 %v84_v35, %v69_v37 }
  0x99   :  { %v124_v43 = vadd.f32 %v120_v39, %v93_v40 }
  0x9a   :  { %v89_v38 = vpop.permute.xlu1 %88  ;;  %v146_v60 = vpop.permute.xlu0 %145 }
  0x9b   :  { %v94_v46 = vadd.f32 %v89_v38, %v70_v41  ;;  %437 = vtanh.f32 %v124_v43 }
  0x9c   :  { %v434_v42 = vpop.eup %433 }
  0x9e   :  { %v265_v16 = vpop.permute.xlu0 %264 }
  0x9f   :  { %v110_v44 = vpop.permute.xlu1 %109  ;;  %v270_v17 = vrot.slane %v265_v16, %v269_v15 }
  0xa0   :  { %v436_v45 = vpop.eup %435  ;;  %v121_v47 = vmul.f32 %v361_v23, %v110_v44 }
  0xa1   :  { %v405_v48 = vpack.c.bf16 %v434_v42, %v436_v45 }
  0xa2   :  { %v125_v49 = vadd.f32 %v121_v47, %v94_v46 }
  0xa3   :  { %406 = vmatprep.subr.bf16.mxu0 %v405_v48 }
  0xa4   :  { %439 = vtanh.f32 %v125_v49  ;;  %408 = vmatpush3.bf16.msra.mxu0 %v405_v48  ;;  %v141_v58 = vpop.permute.xlu1 %140 }
  0xa5   :  { %v438_v50 = vpop.eup %437 }
  0xa8   :  { %v151_v59 = vpop.permute.xlu1 %150 }
  0xac   :  { %v156_v1 = vpop.permute.xlu1 %155 }
  0xae   :  { %v440_v51 = vpop.eup %439 }
  0xaf   :  { %v409_v52 = vpack.c.bf16 %v440_v51, %v438_v50 }
  0xb1   :  { %410 = vmatprep.subr.bf16.mxu0 %v409_v52 }
  0xb2   :  { %412 = vmatpush3.bf16.msra.mxu0 %v409_v52 }
  0xb5   :  { %389 = vmatmul.mubr.msk.f32.vlgmr.msra.gmra.mrb[0].mxu0 %vm158_vm0, %v131_v53 }
  0xb6   :  { %391 = vmatprep.mubr.msk.f32.mxu0 %vm158_vm0, %v132_v54 }
  0xb9   :  { %392 = vmatmul.mubr.msk.f32.gmra.mrb[2].mxu0 %vm158_vm0, %v133_v55 }
 0x188   :  { %v390_v61 = vpop.f32.mrb[0].mxu0 }
 0x189   :  { %v243_v62 = vadd.f32 %v390_v61, %v146_v60  ;;  %v237_v63 = vpop.f32.mrb[1].mxu0 }
 0x18a   :  { %v238_v0 = vadd.f32 %v237_v63, %v141_v58 }
 0x18b   :  { %441 = vtanh.f32 %v243_v62 }
 0x18c   :  { %443 = vtanh.f32 %v238_v0  ;;  %v393_v2 = vpop.f32.mrb[2].mxu0 }
 0x18d   :  { %v253_v3 = vadd.f32 %v393_v2, %v156_v1  ;;  %v247_v4 = vpop.f32.mrb[3].mxu0 }
 0x18e   :  { %v248_v5 = vadd.f32 %v247_v4, %v151_v59 }
 0x18f   :  { %445 = vtanh.f32 %v253_v3 }
 0x190   :  { %447 = vtanh.f32 %v248_v5 }
 0x195   :  { %v442_v6 = vpop.eup %441 }
 0x196   :  { %v444_v7 = vpop.eup %443 }
 0x197   :  { %v414_v8 = vpack.c.bf16 %v442_v6, %v444_v7 }
 0x199   :  { %v446_v9 = vpop.eup %445  ;;  %415 = vmatpush3.bf16.msra.mxu1 %v414_v8 }
 0x19a   :  { %v448_v10 = vpop.eup %447  ;;  %416 = vmatprep.subr.bf16.mxu1 %v475_v56 }
 0x19b   :  { %v417_v11 = vpack.c.bf16 %v446_v9, %v448_v10 }
 0x19d   :  { %418 = vmatpush3.bf16.msra.mxu1 %v417_v11 }
 0x1a0   :  { %403 = vmatmul.mubr.msk.f32.vlgmr.msra.gmra.mrb[0].mxu1 %vm158_vm0, %v260_v12 }
 0x273   :  { %v340_v18 = vpop.f32.mrb[0].mxu1 }
 0x274   :  { %v341_v19 = vadd.f32 %v340_v18, %v270_v17  ;;  %v404_v20 = vpop.f32.mrb[1].mxu1 }
 0x276   :  { %345 = vst.msk [vmem:[#allocation3] sm:$0x1] %vm344_vm2, %v341_v19 }
 0x277   :  { %460 = shalt.err (!%p457_p4)
}
 0x278   :  { %s461_s20 = scalar_lea.hbm %s609_s8, 16 }
 0x279   :  { %p462_p5 = scmp.ne.s32.totalorder %s609_s8, %s461_s20  ;;  %p465_p6 = scmp.lt.u32.totalorder %s461_s20, %s609_s8 }
 0x27b   :  { %p467_p7 = pnand %p465_p6, %p462_p5 }
 0x27d   :  { %470 = shalt.err (!%p467_p7)
}
 0x27e   :  { %355 = dma.vmem_to_hbm [thread:$0]  %s353_s16, 16, %s609_s8, [#allocation4]  }
 0x27f   :  { %471 = dma.done.wait [#allocation4], 16  }
 0x280   :  { %472 = vsyncadd [#allocation4], 4294967280 }
 0x281   :  { %359 = vsyncpa [#allocation4], 1 }

</bundles_post_ra>
